<compile_context>
chip_gen: v5e
topology: v5e:2x2
jax: 0.10.0
libtpu: 0.0.40
codegen_flags: <defaults>
</compile_context>

<pallas_src>
import functools

import jax
import jax.numpy as jnp
from jax import lax
from jax.experimental import pallas as pl
from jax.experimental.pallas import tpu as pltpu


def _round_up(v: int, m: int) -> int:
    return (v + m - 1) // m * m


def _vmem_bytes(tile: int, d_pad: int, itemsize: int) -> int:
    operands = 2 * 2 * tile * d_pad * itemsize   # row + col tiles, double buffered
    temps = 4 * tile * tile * 4                  # dots/key/select f32 temporaries
    return operands + temps + (256 << 10)        # scratch / output / bias slack


def _choose_tile(B: int, d_pad: int, itemsize: int) -> int:
    """Largest tile that fits VMEM, keeps >=2 row tiles, and bounds pad waste."""
    if B <= 128:
        return _round_up(max(B, 1), 8)           # single tile
    budget = 32 << 20
    min_pad = _round_up(B, 128)
    for t in (512, 384, 256, 128):
        b_pad = _round_up(B, t)
        if b_pad // t < 2:                       # feed both v7x TensorCores
            continue
        if b_pad > min_pad + min_pad // 4:       # bound padded-row matmul waste
            continue
        if _vmem_bytes(t, d_pad, itemsize) <= budget:
            return t
    return 128


def _koleo_nn_kernel(xr_ref, xc_ref, bias_ref, idx_ref, best_key, best_idx, *, TR, TC):
    i = pl.program_id(0)            # row-tile index  ("parallel")
    j = pl.program_id(1)            # col-tile index  ("arbitrary" reduction)
    n_col = pl.num_programs(1)

    @pl.when(j == 0)
    def _init():
        best_key[...] = jnp.full_like(best_key, -jnp.inf)
        best_idx[...] = jnp.zeros_like(best_idx)

    # Gram tile on the MXU; contract D of both operands (Mosaic lowers this NT
    # contraction without an explicit XLU transpose of the column operand).
    dots = lax.dot_general(
        xr_ref[...], xc_ref[...],
        dimension_numbers=(((1,), (1,)), ((), ())),
        preferred_element_type=jnp.float32)                       # (TR, TC) f32

    # Padded-column masking folded into one broadcast add (0 for real columns,
    # -inf for padding) — no per-tile iota/compare/select for the pad mask.
    key = dots + bias_ref[...]

    # torch: dots.view(-1)[::n+1].fill_(-1).  With TR == TC the global diagonal
    # only crosses tiles with i == j, so a single select gated on that scalar
    # handles it for every tile.
    rr = lax.broadcasted_iota(jnp.int32, (TR, TC), 0)
    cc = lax.broadcasted_iota(jnp.int32, (TR, TC), 1)
    key = jnp.where((rr == cc) & (i == j), jnp.float32(-1.0), key)

    # Per-row (max, first-argmax) inside this column tile — two lane reductions.
    tile_max = jnp.max(key, axis=1, keepdims=True)                # (TR, 1)
    first_hit = jnp.where(key == tile_max, cc, TC)                # first max wins
    tile_arg = jnp.min(first_hit, axis=1, keepdims=True)          # (TR, 1) int32

    # Online update; strict '>' keeps global first-max tie-break across tiles.
    upd = tile_max > best_key[...]
    best_key[...] = jnp.where(upd, tile_max, best_key[...])
    best_idx[...] = jnp.where(upd, j * TC + tile_arg, best_idx[...])

    @pl.when(j == n_col - 1)
    def _done():
        idx_ref[...] = best_idx[...]


def koleo_loss(student_output: jax.Array, *, tile: int | None = None,
               matmul_dtype=None, eps: float = 1e-8) -> jax.Array:
    """student_output: (B, D). Returns the scalar KoLeo loss (float32).

    matmul_dtype: optionally cast the Gram-matmul operands (e.g. jnp.bfloat16 on
    v6e/v7x for ~3-4x MXU throughput); neighbour selection near ties may shift.
    """
    x = student_output
    B, D = x.shape
    x_mm = x if matmul_dtype is None else x.astype(matmul_dtype)
    itemsize = jnp.dtype(x_mm.dtype).itemsize
    D_pad = _round_up(D, 128)

    if tile is None:
        tile = _choose_tile(B, D_pad, itemsize)
    TR = TC = tile
    B_pad = _round_up(B, tile)
    n_row = B_pad // TR
    n_col = B_pad // TC
    assert n_col == 1 or TC % 128 == 0, "tile must be a multiple of 128 when B > tile"

    pad_b, pad_d = B_pad - B, D_pad - D
    x_p = x_mm
    if pad_b or pad_d:
        x_p = jnp.pad(x_mm, ((0, pad_b), (0, pad_d)))

    # Additive bias: 0 for real columns, -inf for padded columns (never win argmax).
    col_bias = jnp.where(jnp.arange(B_pad) < B, 0.0, -jnp.inf).astype(jnp.float32)
    col_bias = col_bias.reshape(1, B_pad)

    row_spec = pl.BlockSpec((TR, D_pad), lambda i, j: (i, 0))
    col_map = lambda i, j: (j, 0)
    col_spec = pl.BlockSpec((TC, D_pad), col_map)
    # Deeper column pipeline when per-step compute is short (small D, long col axis).
    if n_col >= 3 and D_pad <= 512 and hasattr(pl, "Buffered"):
        try:
            col_spec = pl.BlockSpec((TC, D_pad), col_map, pipeline_mode=pl.Buffered(3))
        except TypeError:
            col_spec = pl.BlockSpec((TC, D_pad), col_map)
    bias_spec = pl.BlockSpec((1, TC), lambda i, j: (0, j))

    # Explicit VMEM budget with headroom; capped below v7x's 64 MiB physical.
    vmem_limit = int(min(max(32 << 20, _vmem_bytes(tile, D_pad, itemsize) + (8 << 20)),
                         48 << 20))

    kernel = functools.partial(_koleo_nn_kernel, TR=TR, TC=TC)

    idx = pl.pallas_call(
        kernel,
        out_shape=jax.ShapeDtypeStruct((B_pad, 1), jnp.int32),
        grid_spec=pltpu.PrefetchScalarGridSpec(
            num_scalar_prefetch=0,
            grid=(n_row, n_col),
            in_specs=[row_spec, col_spec, bias_spec],
            out_specs=pl.BlockSpec((TR, 1), lambda i, j: (i, 0)),
            scratch_shapes=[pltpu.VMEM((TR, 1), jnp.float32),
                            pltpu.VMEM((TR, 1), jnp.int32)],
        ),
        compiler_params=pltpu.CompilerParams(
            dimension_semantics=("parallel", "arbitrary"),
            vmem_limit_bytes=vmem_limit),
        cost_estimate=pl.CostEstimate(
            flops=2 * B_pad * B_pad * D_pad,
            transcendentals=0,
            bytes_accessed=itemsize * B_pad * D_pad * (n_row + 1)
                           + 4 * n_row * B_pad + 4 * B_pad),
    )(x_p, x_p, col_bias)

    I = idx[:B, 0]
    # Distance recomputed from the explicit diff (matches nn.PairwiseDistance(2,
    # eps=1e-8) and avoids Gram-identity f32 cancellation for close neighbours).
    xf = x.astype(jnp.float32)
    diff = xf - xf[I] + jnp.float32(1e-8)
    dist = jnp.sqrt(jnp.sum(diff * diff, axis=1))
    return -jnp.mean(jnp.log(dist + jnp.float32(eps)))


def _koleo_loss_ref(x: jax.Array) -> jax.Array:
    """Plain-JAX reference mirroring the PyTorch module."""
    x = x.astype(jnp.float32)
    n = x.shape[0]
    dots = x @ x.T
    dots = dots.at[jnp.arange(n), jnp.arange(n)].set(-1.0)
    I = jnp.argmax(dots, axis=1)
    diff = x - x[I] + 1e-8
    dist = jnp.sqrt(jnp.sum(diff * diff, axis=1))
    return -jnp.mean(jnp.log(dist + 1e-8))


if __name__ == "__main__":
    key = jax.random.PRNGKey(0)
    k1, k2, k3 = jax.random.split(key, 3)

    # Single-tile path (B=8, D=32 student embeddings).
    x_small = jax.random.normal(k1, (8, 32), dtype=jnp.float32)
    loss_small = koleo_loss(x_small)
    jax.block_until_ready(loss_small)
    ref_small = _koleo_loss_ref(x_small)
    assert jnp.allclose(loss_small, ref_small, rtol=1e-3, atol=1e-3), (loss_small, ref_small)

    # Multi-tile path: B=200 -> adaptive tile 128, B_pad=256, grid (2,2).
    # Exercises the cross-tile online max, i==j diagonal gating, padded columns.
    x_mid = jax.random.normal(k2, (200, 96), dtype=jnp.float32)
    loss_mid = koleo_loss(x_mid)
    jax.block_until_ready(loss_mid)
    ref_mid = _koleo_loss_ref(x_mid)
    assert jnp.allclose(loss_mid, ref_mid, rtol=1e-3, atol=1e-3), (loss_mid, ref_mid)

    # Longer column axis: B=300 -> grid (3,3); exercises adaptive tile selection
    # and the Buffered(3) column pipeline for small D.
    x_big = jax.random.normal(k3, (300, 64), dtype=jnp.float32)
    loss_big = koleo_loss(x_big)
    jax.block_until_ready(loss_big)
    ref_big = _koleo_loss_ref(x_big)
    assert jnp.allclose(loss_big, ref_big, rtol=1e-3, atol=1e-3), (loss_big, ref_big)

    print("KERNEL_OK")
</pallas_src>

<mosaic_0001>
module attributes {stable_mosaic.version = 11 : i64} {
  func.func @_koleo_nn_kernel(%arg0: i32, %arg1: i32, %arg2: memref<8x128xf32, #tpu.memory_space<vmem>>, %arg3: memref<8x128xf32, #tpu.memory_space<vmem>>, %arg4: memref<1x8xf32, #tpu.memory_space<vmem>>, %arg5: memref<8x1xi32, #tpu.memory_space<vmem>>, %arg6: memref<8x1xf32, #tpu.memory_space<vmem>>, %arg7: memref<8x1xi32, #tpu.memory_space<vmem>>) attributes {dimension_semantics = [#tpu.dimension_semantics<parallel>, #tpu.dimension_semantics<arbitrary>], iteration_bounds = array<i64: 1, 1>, scalar_prefetch = 0 : i64, scratch_operands = 2 : i64, tpu.core_type = #tpu.core_type<tc>, window_params = [{transform_indices = @transform_0, window_bounds = array<i64: 8, 128>}, {transform_indices = @transform_1, window_bounds = array<i64: 8, 128>}, {transform_indices = @transform_2, window_bounds = array<i64: 1, 8>}, {transform_indices = @transform_3, window_bounds = array<i64: 8, 1>}]} {
    %c0_i32 = arith.constant 0 : i32
    %0 = arith.cmpi eq, %arg1, %c0_i32 : i32
    %1 = arith.extui %0 : i1 to i32
    %c0_i32_0 = arith.constant 0 : i32
    %2 = arith.cmpi ne, %1, %c0_i32_0 : i32
    scf.if %2 {
      %cst_22 = arith.constant 0xFF800000 : f32
      %39 = vector.broadcast %cst_22 : f32 to vector<8x1xf32>
      %c0_23 = arith.constant 0 : index
      %c0_24 = arith.constant 0 : index
      %40 = vector.load %arg6[%c0_23, %c0_24] : memref<8x1xf32, #tpu.memory_space<vmem>>, vector<8x1xf32>
      tpu.vector_store %arg6[%c0_23, %c0_24], %39 {strides = array<i32>} : memref<8x1xf32, #tpu.memory_space<vmem>>, vector<8x1xf32>,
      %c0_i32_25 = arith.constant 0 : i32
      %41 = vector.broadcast %c0_i32_25 : i32 to vector<8x1xi32>
      %c0_26 = arith.constant 0 : index
      %c0_27 = arith.constant 0 : index
      %42 = vector.load %arg7[%c0_26, %c0_27] : memref<8x1xi32, #tpu.memory_space<vmem>>, vector<8x1xi32>
      tpu.vector_store %arg7[%c0_26, %c0_27], %41 {strides = array<i32>} : memref<8x1xi32, #tpu.memory_space<vmem>>, vector<8x1xi32>,
    } else {
    }
    %c0 = arith.constant 0 : index
    %c0_1 = arith.constant 0 : index
    %3 = vector.load %arg2[%c0, %c0_1] : memref<8x128xf32, #tpu.memory_space<vmem>>, vector<8x128xf32>
    %c0_2 = arith.constant 0 : index
    %c0_3 = arith.constant 0 : index
    %4 = vector.load %arg3[%c0_2, %c0_3] : memref<8x128xf32, #tpu.memory_space<vmem>>, vector<8x128xf32>
    %cst = arith.constant dense<0.000000e+00> : vector<8x8xf32>
    %5 = tpu.matmul %3, %4, %cst {dimension_numbers = #tpu.dot_dimension_numbers<[1], [1], [0], [0], [0, 0, 1, 0], [], []>} : vector<8x128xf32>, vector<8x128xf32>, vector<8x8xf32> -> vector<8x8xf32>
    %c0_4 = arith.constant 0 : index
    %c0_5 = arith.constant 0 : index
    %6 = vector.load %arg4[%c0_4, %c0_5] : memref<1x8xf32, #tpu.memory_space<vmem>>, vector<1x8xf32>
    %7 = vector.broadcast %6 : vector<1x8xf32> to vector<8x8xf32>
    %8 = arith.addf %5, %7 : vector<8x8xf32>
    %9 = tpu.iota {dimensions = array<i32: 0>} : vector<8x8xi32>
    %10 = tpu.iota {dimensions = array<i32: 1>} : vector<8x8xi32>
    %11 = arith.cmpi eq, %9, %10 : vector<8x8xi32>
    %12 = arith.cmpi eq, %arg0, %arg1 : i32
    %13 = vector.broadcast %12 : i1 to vector<8x8xi1>
    %14 = arith.andi %11, %13 : vector<8x8xi1>
    %cst_6 = arith.constant -1.000000e+00 : f32
    %15 = vector.broadcast %cst_6 : f32 to vector<8x8xf32>
    %16 = arith.select %14, %15, %8 : vector<8x8xi1>, vector<8x8xf32>
    %cst_7 = arith.constant dense<0xFF800000> : vector<8xf32>
    %17 = vector.multi_reduction <maximumf>, %16, %cst_7 [1] : vector<8x8xf32> to vector<8xf32>
    %18 = vector.shape_cast %17 : vector<8xf32> to vector<8x1xf32>
    %19 = vector.broadcast %18 : vector<8x1xf32> to vector<8x8xf32>
    %20 = arith.cmpf oeq, %16, %19 : vector<8x8xf32>
    %c8_i32 = arith.constant 8 : i32
    %21 = vector.broadcast %c8_i32 : i32 to vector<8x8xi32>
    %22 = arith.select %20, %10, %21 : vector<8x8xi1>, vector<8x8xi32>
    %cst_8 = arith.constant dense<2147483647> : vector<8xi32>
    %23 = vector.multi_reduction <minsi>, %22, %cst_8 [1] : vector<8x8xi32> to vector<8xi32>
    %24 = vector.shape_cast %23 : vector<8xi32> to vector<8x1xi32>
    %c0_9 = arith.constant 0 : index
    %c0_10 = arith.constant 0 : index
    %25 = vector.load %arg6[%c0_9, %c0_10] : memref<8x1xf32, #tpu.memory_space<vmem>>, vector<8x1xf32>
    %26 = arith.cmpf ogt, %18, %25 : vector<8x1xf32>
    %c0_11 = arith.constant 0 : index
    %c0_12 = arith.constant 0 : index
    %27 = vector.load %arg6[%c0_11, %c0_12] : memref<8x1xf32, #tpu.memory_space<vmem>>, vector<8x1xf32>
    %28 = arith.select %26, %18, %27 : vector<8x1xi1>, vector<8x1xf32>
    %c0_13 = arith.constant 0 : index
    %c0_14 = arith.constant 0 : index
    %29 = vector.load %arg6[%c0_13, %c0_14] : memref<8x1xf32, #tpu.memory_space<vmem>>, vector<8x1xf32>
    tpu.vector_store %arg6[%c0_13, %c0_14], %28 {strides = array<i32>} : memref<8x1xf32, #tpu.memory_space<vmem>>, vector<8x1xf32>,
    %c8_i32_15 = arith.constant 8 : i32
    %30 = arith.muli %arg1, %c8_i32_15 : i32
    %31 = vector.broadcast %30 : i32 to vector<8x1xi32>
    %32 = arith.addi %31, %24 : vector<8x1xi32>
    %c0_16 = arith.constant 0 : index
    %c0_17 = arith.constant 0 : index
    %33 = vector.load %arg7[%c0_16, %c0_17] : memref<8x1xi32, #tpu.memory_space<vmem>>, vector<8x1xi32>
    %34 = arith.select %26, %32, %33 : vector<8x1xi1>, vector<8x1xi32>
    %c0_18 = arith.constant 0 : index
    %c0_19 = arith.constant 0 : index
    %35 = vector.load %arg7[%c0_18, %c0_19] : memref<8x1xi32, #tpu.memory_space<vmem>>, vector<8x1xi32>
    tpu.vector_store %arg7[%c0_18, %c0_19], %34 {strides = array<i32>} : memref<8x1xi32, #tpu.memory_space<vmem>>, vector<8x1xi32>,
    %c0_i32_20 = arith.constant 0 : i32
    %36 = arith.cmpi eq, %arg1, %c0_i32_20 : i32
    %37 = arith.extui %36 : i1 to i32
    %c0_i32_21 = arith.constant 0 : i32
    %38 = arith.cmpi ne, %37, %c0_i32_21 : i32
    scf.if %38 {
      %c0_22 = arith.constant 0 : index
      %c0_23 = arith.constant 0 : index
      %39 = vector.load %arg7[%c0_22, %c0_23] : memref<8x1xi32, #tpu.memory_space<vmem>>, vector<8x1xi32>
      %c0_24 = arith.constant 0 : index
      %c0_25 = arith.constant 0 : index
      %40 = vector.load %arg5[%c0_24, %c0_25] : memref<8x1xi32, #tpu.memory_space<vmem>>, vector<8x1xi32>
      tpu.vector_store %arg5[%c0_24, %c0_25], %39 {strides = array<i32>} : memref<8x1xi32, #tpu.memory_space<vmem>>, vector<8x1xi32>,
    } else {
    }
    return
  }
  func.func @transform_0(%arg0: i32, %arg1: i32) -> (i32, i32) {
    %c0_i32 = arith.constant 0 : i32
    %c0_i32_0 = arith.constant 0 : i32
    return %arg0, %c0_i32 : i32, i32
  }
  func.func @transform_1(%arg0: i32, %arg1: i32) -> (i32, i32) {
    %c0_i32 = arith.constant 0 : i32
    %c0_i32_0 = arith.constant 0 : i32
    return %arg1, %c0_i32 : i32, i32
  }
  func.func @transform_2(%arg0: i32, %arg1: i32) -> (i32, i32) {
    %c0_i32 = arith.constant 0 : i32
    %c0_i32_0 = arith.constant 0 : i32
    return %c0_i32, %arg1 : i32, i32
  }
  func.func @transform_3(%arg0: i32, %arg1: i32) -> (i32, i32) {
    %c0_i32 = arith.constant 0 : i32
    %c0_i32_0 = arith.constant 0 : i32
    return %arg0, %c0_i32 : i32, i32
  }
}

</mosaic_0001>

<bundles_post_ra>
// kernel: tpu_custom_call.1
= control target key start
LH: loop header
LB: loop body
LE: loop exit
PB: predicated region body
PF: predicated region fallthrough
CT: control target
= control target key end

     0   :  { %8 = vsyncpa [#allocation5], 0  ;;  %s229_s0 = inlined_call_operand.hbm [shape: f32[8,128], index: 0, kind: input, shape index: {}]   ;;  %s230_s1 = inlined_call_operand.hbm [shape: f32[8,128], index: 1, kind: input, shape index: {}]   ;;  %s231_s2 = inlined_call_operand.vmem [shape: f32[1,8], index: 2, kind: input, shape index: {}]   ;;  %s232_s3 = inlined_call_operand.vmem [shape: s32[8,1], index: 3, kind: output, shape index: {}]  }
   0x1   :  { %s15_s14 = sshll.u32 %s229_s0, 4  ;;  %s16_s14 = int_to_ptr.hbm [resolvable:$true] %s15_s14 }
   0x2   :  { %9 = vsyncpa [#allocation7], 0  ;;  %s186_s15 = smov [#allocation4]   ;;  %s26_s19 = sshll.u32 %s230_s1, 4  ;;  %s27_s19 = int_to_ptr.hbm [resolvable:$true] %s26_s19 }
   0x3   :  { %s17_s16 = sshll.u32 %s186_s15, 4  ;;  %s187_s20 = smov [#allocation6]   ;;  %s18_s16 = int_to_ptr.vmem [resolvable:$true] %s17_s16 }
   0x4   :  { %20 = dma.hbm_to_vmem [thread:$0]  %s16_s14, 128, %s18_s16, [#allocation5]  }
   0x5   :  { %s28_s21 = sshll.u32 %s187_s20, 4  ;;  %s29_s21 = int_to_ptr.vmem [resolvable:$true] %s28_s21 }
   0x6   :  { %31 = dma.hbm_to_vmem [thread:$0]  %s27_s19, 128, %s29_s21, [#allocation7]  }
   0x7   :  { %182 = dma.done.wait [#allocation5], 128  }
   0x8   :  { %183 = vsyncadd [#allocation5], 4294967168 }
   0x9   :  { %184 = dma.done.wait [#allocation7], 128  }
   0xa   :  { %185 = vsyncadd [#allocation7], 4294967168  ;;  %v50_v0 = vld [vmem:[#allocation6] sm:$0xff]  ;;  %v49_v1 = vld [vmem:[#allocation4] sm:$0xff]  ;;  %vm46_vm0 = vcmask 7168   ;;  %v188_v2 = vmov -inf   ;;  %v75_v3 = vlaneseq }
   0xb   :  { %70 = vmatpush.xpose.msra.mxu0 %v50_v0  ;;  %47 = vst.msk [vmem:[#allocation2] sm:$0xff] %vm46_vm0, %v188_v2  ;;  %v133_v6 = vld [vmem:[%s231_s2] ss:$0 sm:$0xff]  ;;  %vm86_vm2 = vcmask 64512   ;;  %v189_v18 = vmov 0  }
   0xc   :  { %v76_v4 = vshrl.u32 %v75_v3, 7  ;;  %v78_v5 = vand.u32 127, %v75_v3  ;;  %48 = vst.msk [vmem:[#allocation3] sm:$0xff] %vm46_vm0, %v189_v18 }
   0xe   :  { %71 = vmatmul.f32.vlgmr.msra.gmra.mxu0 %v49_v1  ;;  %vm79_vm1 = vcmp.eq.s32.totalorder %v76_v4, %v78_v5 }
  0x12   :  { %v107_v11 = vld [vmem:[#allocation2] sm:$0xff] }
  0x13   :  { %v115_v27 = vld [vmem:[#allocation3] sm:$0xff] }
  0x8b   :  { %v72_v7 = vpop.f32.mrf.mxu0 }
  0x8c   :  { %v73_v8 = vadd.f32 %v133_v6, %v72_v7 }
  0x8e   :  { %v85_v9 = vsel %vm79_vm1, -1.0, %v73_v8 }
  0x8f   :  { %v87_v10 = vsel %vm86_vm2, %v85_v9, -inf }
  0x90   :  { %88 = vmax.xlane.f32.xlu0 %v87_v10 }
 0x103   :  { %v89_v12 = vpop.xlane.xlu0 %88 }
 0x104   :  { %vm90_vm3 = vcmp.eq.f32.partialorder %v85_v9, %v89_v12  ;;  %vm108_vm4 = vcmp.gt.f32.partialorder %v89_v12, %v107_v11 }
 0x105   :  { %v109_v13 = vsel %vm108_vm4, %v89_v12, %v107_v11  ;;  %v91_v14 = vsel %vm90_vm3, %v78_v5, 8 }
 0x106   :  { %111 = vst.msk [vmem:[#allocation2] sm:$0xff] %vm46_vm0, %v109_v13  ;;  %v92_v15 = vsel %vm86_vm2, %v91_v14, 2147483647 }
 0x107   :  { %v94_v16 = vshra.s32 %v92_v15, 16  ;;  %v93_v19 = vand.u32 65535, %v92_v15 }
 0x109   :  { %v96_v17 = vcvt.s32.f32 %v94_v16  ;;  %v95_v21 = vcvt.s32.f32 %v93_v19 }
 0x10b   :  { %97 = vmin.xlane.f32.xlu0 %v96_v17 }
 0x17e   :  { %v98_v20 = vpop.xlane.xlu0 %97 }
 0x17f   :  { %vm99_vm5 = vcmp.eq.f32.partialorder %v96_v17, %v98_v20  ;;  %v104_v23 = vcvt.f32.s32 %v98_v20 }
 0x180   :  { %v100_v22 = vsel %vm99_vm5, %v95_v21, inf }
 0x181   :  { %101 = vmin.xlane.f32.xlu1 %v100_v22  ;;  %v105_v25 = vshll.u32 %v104_v23, 16 }
 0x1f4   :  { %v102_v24 = vpop.xlane.xlu1 %101 }
 0x1f5   :  { %v103_v26 = vcvt.f32.s32 %v102_v24 }
 0x1f7   :  { %v106_v28 = vadd.s32 %v105_v25, %v103_v26 }
 0x1f9   :  { %v116_v29 = vsel %vm108_vm4, %v106_v28, %v115_v27 }
 0x1fa   :  { %117 = vst.msk [vmem:[#allocation3] sm:$0xff] %vm46_vm0, %v116_v29 }
 0x201   :  { %v121_v30 = vld [vmem:[#allocation3] sm:$0xff] }
 0x202   :  { %122 = vst.msk [vmem:[%s232_s3] sm:$0xff] %vm46_vm0, %v121_v30 }
 0x203   :  { %127 = vsyncpa [#allocation5], 1 }
 0x204   :  { %128 = vsyncpa [#allocation7], 1 }

</bundles_post_ra>
